<compile_context>
chip_gen: v7x
topology: tpu7x:2x2x1
jax: 0.10.0
libtpu: 0.0.40
codegen_flags: <defaults>
</compile_context>

<pallas_src>
import numpy as np
import jax
import jax.numpy as jnp
from jax.experimental import pallas as pl
from jax.experimental.pallas import tpu as pltpu

KERNEL_SIZE = 5
DILATION = 2
PAD = (KERNEL_SIZE - 1) * DILATION  # == 8, causal left pad


def _vmem_spec():
    return pl.BlockSpec(memory_space=pltpu.MemorySpace.VMEM)


# ---------------------------------------------------------------------------
# Stage 1: folded deconv chain -- a single lane-dense matmul
#   x_ref: (B, latent)
#   w_ref: (latent, max_visit*emb)   folded chain weight (time-major columns)
#   b_ref: (1, max_visit*emb)        folded chain bias
#   o_ref: (B, max_visit*emb)
# ---------------------------------------------------------------------------
def deconv_fused_kernel(x_ref, w_ref, b_ref, o_ref):
    o_ref[...] = (
        jnp.dot(x_ref[...], w_ref[...], preferred_element_type=jnp.float32)
        + b_ref[...]
    )


# ---------------------------------------------------------------------------
# Shared helper: dilated causal conv for one batch element (2D, tap-major).
#   xp    : (L + PAD, Cin)  already left-padded (value or Ref)
#   w_ref : (5, Cin, Cout)  tap-major weights
#   b_ref : (1, Cout)
#   returns (L, Cout) fp32:  out[t] = sum_k xp[t + 2k] @ w[k] + b
# ---------------------------------------------------------------------------
def _dilated_conv(xp, w_ref, b_ref, L):
    cout = w_ref.shape[2]
    acc = jnp.zeros((L, cout), jnp.float32)
    for k in range(KERNEL_SIZE):
        acc = acc + jnp.dot(
            xp[DILATION * k : DILATION * k + L, :],
            w_ref[k],
            preferred_element_type=jnp.float32,
        )
    return acc + b_ref[...]


# ---------------------------------------------------------------------------
# Stage 2: fused causal conv1 + conv2, grid over batch (batch dim squeezed).
#   x_ref : (L, emb)
#   o_ref : (L + PAD, 2*emb)  first PAD rows are zeros -> output is emitted
#                             already left-padded for stage 3
# ---------------------------------------------------------------------------
def causal12_kernel(x_ref, w1_ref, b1_ref, w2_ref, b2_ref, o_ref):
    L, c1 = x_ref.shape
    xp1 = jnp.concatenate(
        [jnp.zeros((PAD, c1), jnp.float32), x_ref[...]], axis=0)   # (L+PAD, emb)
    h1 = _dilated_conv(xp1, w1_ref, b1_ref, L)                     # (L, emb)

    xp2 = jnp.concatenate(
        [jnp.zeros((PAD, h1.shape[-1]), jnp.float32), h1], axis=0)  # (L+PAD, emb)
    h2 = _dilated_conv(xp2, w2_ref, b2_ref, L)                      # (L, 2*emb)

    c2 = w2_ref.shape[2]
    o_ref[...] = jnp.concatenate(
        [jnp.zeros((PAD, c2), jnp.float32), h2], axis=0)            # (L+PAD, 2*emb)


# ---------------------------------------------------------------------------
# Stage 3: causal conv3 tiled over the vocab axis, grid (batch, vocab_tiles).
#   x_ref : (L + PAD, Cin)       stage-2 output, already left-padded
#   w_ref : (5, Cin, TILE_N)     one vocab tile of the tap-major weight
#   b_ref : (1, TILE_N)
#   o_ref : (L, TILE_N)
# ---------------------------------------------------------------------------
def conv3_kernel(x_ref, w_ref, b_ref, o_ref):
    L = o_ref.shape[0]
    o_ref[...] = _dilated_conv(x_ref, w_ref, b_ref, L)


# ---------------------------------------------------------------------------
# Parameter setup (deterministic, synthetic), channels-last / tap-major:
#   ConvTranspose1d weight (Cin, Cout, K) -> stored as (K, Cin, Cout)
#   Conv1d          weight (Cout, Cin, K) -> stored as (K, Cin, Cout)
# ---------------------------------------------------------------------------
def init_decoder_params(key, emb_size, latent_dim, total_vocab_size, max_visit):
    n_deconv = int(np.ceil(np.power(max_visit, 1.0 / 3.0)))
    params = {"deconv": [], "causal": []}
    for i in range(n_deconv):
        cin = latent_dim if i == 0 else emb_size
        key, k1, k2 = jax.random.split(key, 3)
        w = jax.random.normal(k1, (3, cin, emb_size), jnp.float32) * 0.1
        b = jax.random.normal(k2, (1, emb_size), jnp.float32) * 0.1
        params["deconv"].append((w, b))
    conv_dims = [
        (emb_size, emb_size),
        (emb_size, 2 * emb_size),
        (2 * emb_size, total_vocab_size),
    ]
    for cin, cout in conv_dims:
        key, k1, k2 = jax.random.split(key, 3)
        w = jax.random.normal(k1, (KERNEL_SIZE, cin, cout), jnp.float32) * 0.1
        b = jax.random.normal(k2, (1, cout), jnp.float32) * 0.1
        params["causal"].append((w, b))
    return params


def fold_deconv_chain(deconv_params, latent_dim, max_visit):
    """Fold the stride-3 ConvTranspose1d chain (input length 1) into a single
    per-time-step linear map: out[:, t, :] = x @ A[t] + c[t].

    With stride == kernel == 3 and input length 1, every output step t is
    produced by exactly one tap path (k_1 .. k_n), so the fold is exact.
    This is one-time weight prep on the wrapper side (constant-foldable).
    """
    A = jnp.eye(latent_dim, dtype=jnp.float32)[None, :, :]   # (T=1, latent, latent)
    c = jnp.zeros((1, 1, latent_dim), jnp.float32)
    T = 1
    for w, b in deconv_params:                               # w: (3, Cin, Cout)
        cout = w.shape[2]
        A = jnp.einsum("tic,kco->tkio", A, w).reshape(T * 3, latent_dim, cout)
        c = (jnp.einsum("tic,kco->tkio", c, w) + b).reshape(T * 3, 1, cout)
        T *= 3
    assert T >= max_visit, "deconv chain produces fewer steps than max_visit"
    A = A[:max_visit]                                        # (L, latent, emb)
    c = c[:max_visit]                                        # (L, 1, emb)
    emb = A.shape[-1]
    w_fold = jnp.transpose(A, (1, 0, 2)).reshape(latent_dim, max_visit * emb)
    b_fold = jnp.transpose(c, (1, 0, 2)).reshape(1, max_visit * emb)
    return w_fold, b_fold


# ---------------------------------------------------------------------------
# Full Decoder forward (Pallas) + pure-JAX reference for verification
# ---------------------------------------------------------------------------
def decoder_forward(x, params, max_visit, tile_n=128):
    B, latent_dim = x.shape
    emb = params["deconv"][0][0].shape[2]
    L = max_visit
    (w1, b1), (w2, b2), (w3, b3) = params["causal"]
    c2 = w2.shape[2]           # 2*emb
    cin3 = w3.shape[1]         # 2*emb
    vocab = w3.shape[2]

    # ---- stage 1: folded deconv chain (one lane-dense MXU matmul) ----
    w_fold, b_fold = fold_deconv_chain(params["deconv"], latent_dim, L)
    y = pl.pallas_call(
        deconv_fused_kernel,
        out_shape=jax.ShapeDtypeStruct((B, L * emb), jnp.float32),
        in_specs=[_vmem_spec(), _vmem_spec(), _vmem_spec()],
        out_specs=_vmem_spec(),
    )(x, w_fold, b_fold)
    h = y.reshape(B, L, emb)   # contiguous trailing-dim split: free at XLA level

    # ---- stage 2: fused causal conv1 + conv2, padding built in VMEM ----
    h12 = pl.pallas_call(
        causal12_kernel,
        out_shape=jax.ShapeDtypeStruct((B, L + PAD, c2), jnp.float32),
        grid=(B,),
        in_specs=[
            pl.BlockSpec((None, L, emb), lambda b: (b, 0, 0)),
            pl.BlockSpec((KERNEL_SIZE, emb, emb), lambda b: (0, 0, 0)),
            pl.BlockSpec((1, emb), lambda b: (0, 0)),
            pl.BlockSpec((KERNEL_SIZE, emb, c2), lambda b: (0, 0, 0)),
            pl.BlockSpec((1, c2), lambda b: (0, 0)),
        ],
        out_specs=pl.BlockSpec((None, L + PAD, c2), lambda b: (b, 0, 0)),
        compiler_params=pltpu.CompilerParams(
            dimension_semantics=("parallel",)),
    )(h, w1, b1, w2, b2)

    # ---- stage 3: vocab-tiled causal conv3 (lane-dense 128-wide tiles) ----
    # NOTE: for very large vocab on v6e/v7x, casting w3/h12 to bfloat16 (with
    # fp32 accumulation) would halve the dominant weight-DMA bytes; kept fp32
    # here to match the fp32 reference bit-for-bit tolerance.
    v_pad = ((vocab + tile_n - 1) // tile_n) * tile_n
    if v_pad != vocab:         # pad weight/bias once; zero columns -> exact
        w3 = jnp.pad(w3, ((0, 0), (0, 0), (0, v_pad - vocab)))
        b3 = jnp.pad(b3, ((0, 0), (0, v_pad - vocab)))
    n_vt = v_pad // tile_n
    flops = 2 * B * L * KERNEL_SIZE * cin3 * v_pad
    bytes_accessed = 4 * (B * (L + PAD) * cin3 + KERNEL_SIZE * cin3 * v_pad
                          + v_pad + B * L * v_pad)
    out = pl.pallas_call(
        conv3_kernel,
        out_shape=jax.ShapeDtypeStruct((B, L, v_pad), jnp.float32),
        grid=(B, n_vt),
        in_specs=[
            pl.BlockSpec((None, L + PAD, cin3), lambda b, j: (b, 0, 0)),
            pl.BlockSpec((KERNEL_SIZE, cin3, tile_n), lambda b, j: (0, 0, j)),
            pl.BlockSpec((1, tile_n), lambda b, j: (0, j)),
        ],
        out_specs=pl.BlockSpec((None, L, tile_n), lambda b, j: (b, 0, j)),
        compiler_params=pltpu.CompilerParams(
            dimension_semantics=("parallel", "parallel"),
            vmem_limit_bytes=32 * 1024 * 1024,
        ),
        cost_estimate=pl.CostEstimate(
            flops=flops, transcendentals=0, bytes_accessed=bytes_accessed),
    )(h12, w3, b3)
    return out[:, :, :vocab]   # drop vocab padding


def decoder_forward_ref(x, params, max_visit):
    out = x[:, None, :]
    for w, b in params["deconv"]:
        B, T, _ = out.shape
        y = jnp.einsum("btc,kco->btko", out, w) + b
        out = y.reshape(B, 3 * T, -1)
    out = out[:, :max_visit, :]
    for w, b in params["causal"]:
        B, L, _ = out.shape
        xp = jnp.pad(out, ((0, 0), (PAD, 0), (0, 0)))
        out = sum(
            jnp.einsum("btc,co->bto",
                       xp[:, DILATION * k:DILATION * k + L, :], w[k])
            for k in range(KERNEL_SIZE)
        ) + b
    return out


if __name__ == "__main__":
    B, latent_dim, emb_size, vocab, max_visit = 2, 16, 32, 300, 20

    key = jax.random.PRNGKey(0)
    key, xk = jax.random.split(key)
    x = jax.random.normal(xk, (B, latent_dim), jnp.float32)
    params = init_decoder_params(key, emb_size, latent_dim, vocab, max_visit)

    out = jax.block_until_ready(decoder_forward(x, params, max_visit))
    ref = decoder_forward_ref(x, params, max_visit)

    assert out.shape == (B, max_visit, vocab), out.shape
    np.testing.assert_allclose(np.asarray(out), np.asarray(ref),
                               rtol=1e-4, atol=1e-4)
    print("KERNEL_OK")
</pallas_src>

<mosaic_0001>
module attributes {stable_mosaic.version = 11 : i64} {
  func.func @deconv_fused_kernel(%arg0: memref<2x16xf32, #tpu.memory_space<vmem>>, %arg1: memref<16x640xf32, #tpu.memory_space<vmem>>, %arg2: memref<1x640xf32, #tpu.memory_space<vmem>>, %arg3: memref<2x640xf32, #tpu.memory_space<vmem>>) attributes {dimension_semantics = [], scalar_prefetch = 0 : i64, scratch_operands = 0 : i64, tpu.core_type = #tpu.core_type<tc>} {
    %c0 = arith.constant 0 : index
    %c0_0 = arith.constant 0 : index
    %0 = vector.load %arg0[%c0, %c0_0] : memref<2x16xf32, #tpu.memory_space<vmem>>, vector<2x16xf32>
    %c0_1 = arith.constant 0 : index
    %c0_2 = arith.constant 0 : index
    %1 = vector.load %arg1[%c0_1, %c0_2] : memref<16x640xf32, #tpu.memory_space<vmem>>, vector<16x640xf32>
    %cst = arith.constant dense<0.000000e+00> : vector<2x640xf32>
    %2 = tpu.matmul %0, %1, %cst {dimension_numbers = #tpu.dot_dimension_numbers<[1], [0], [0], [1], [0, 0, 1, 1], [], []>} : vector<2x16xf32>, vector<16x640xf32>, vector<2x640xf32> -> vector<2x640xf32>
    %c0_3 = arith.constant 0 : index
    %c0_4 = arith.constant 0 : index
    %3 = vector.load %arg2[%c0_3, %c0_4] : memref<1x640xf32, #tpu.memory_space<vmem>>, vector<1x640xf32>
    %4 = vector.broadcast %3 : vector<1x640xf32> to vector<2x640xf32>
    %5 = arith.addf %2, %4 : vector<2x640xf32>
    %c0_5 = arith.constant 0 : index
    %c0_6 = arith.constant 0 : index
    %6 = vector.load %arg3[%c0_5, %c0_6] : memref<2x640xf32, #tpu.memory_space<vmem>>, vector<2x640xf32>
    tpu.vector_store %arg3[%c0_5, %c0_6], %5 {strides = array<i32>} : memref<2x640xf32, #tpu.memory_space<vmem>>, vector<2x640xf32>,
    return
  }
}

</mosaic_0001>

<bundles_post_ra>
// kernel: tpu_custom_call.1
= control target key start
LH: loop header
LB: loop body
LE: loop exit
PB: predicated region body
PF: predicated region fallthrough
CT: control target
= control target key end

     0   :  { %8 = vsyncpa [#allocation3], 0  ;;  %s525_s0 = inlined_call_operand.hbm [shape: f32[2,16], index: 0, kind: input, shape index: {}]   ;;  %s526_s1 = inlined_call_operand.hbm [shape: f32[16,640], index: 1, kind: input, shape index: {}]   ;;  %s527_s2 = inlined_call_operand.vmem [shape: f32[1,640], index: 2, kind: input, shape index: {}]   ;;  %s528_s3 = inlined_call_operand.hbm [shape: f32[2,640], index: 3, kind: output, shape index: {}]  }
   0x1   :  { %9 = vsyncpa [#allocation6], 0 }
   0x2   :  { %10 = vsyncpa [#allocation4], 0  ;;  %s450_s12 = smov [#allocation2]   ;;  %s451_s14 = smov [#allocation5]  }
   0x3   :  { %s17_s13 = sshll.u32 %s450_s12, 4  ;;  %s26_s15 = sshll.u32 %s451_s14, 4  ;;  %s18_s13 = int_to_ptr.vmem [resolvable:$true] %s17_s13  ;;  %s479_s15 = int_to_ptr.vmem [resolvable:$true] %s26_s15 }
   0x4   :  { %s378_s18 = scalar_lea.hbm %s525_s0, 32 }
   0x5   :  { %p379_p0 = scmp.ne.s32.totalorder %s525_s0, %s378_s18  ;;  %p382_p1 = scmp.lt.u32.totalorder %s378_s18, %s525_s0 }
   0x7   :  { %p384_p2 = pnand %p382_p1, %p379_p0 }
   0x9   :  { %387 = shalt.err (!%p384_p2)
}
   0xa   :  { %s388_s23 = scalar_lea.vmem %s18_s13, 32  ;;  %p393_p4 = scmp.lt.s32.totalorder %s18_s13, %s18_s13 }
   0xb   :  { %p389_p3 = scmp.ne.s32.totalorder %s18_s13, %s388_s23  ;;  %p394_p5 = scmp.lt.s32.totalorder %s388_s23, %s388_s23 }
   0xd   :  { %p395_p6 = por %p394_p5, %p393_p4 }
   0xf   :  { %p396_p7 = pnand %p395_p6, %p389_p3 }
  0x11   :  { %399 = shalt.err (!%p396_p7)
}
  0x12   :  { %20 = dma.hbm_to_vmem [thread:$0]  %s525_s0, 32, %s18_s13, [#allocation3]  }
  0x13   :  { %s400_s28 = scalar_lea.hbm %s526_s1, 1280 }
  0x14   :  { %p401_p8 = scmp.ne.s32.totalorder %s526_s1, %s400_s28  ;;  %p404_p9 = scmp.lt.u32.totalorder %s400_s28, %s526_s1 }
  0x16   :  { %p406_p10 = pnand %p404_p9, %p401_p8 }
  0x18   :  { %409 = shalt.err (!%p406_p10)
}
  0x19   :  { %s410_s6 = scalar_lea.vmem %s479_s15, 1280  ;;  %p415_p12 = scmp.lt.s32.totalorder %s479_s15, %s479_s15 }
  0x1a   :  { %p411_p11 = scmp.ne.s32.totalorder %s479_s15, %s410_s6  ;;  %p416_p13 = scmp.lt.s32.totalorder %s410_s6, %s410_s6 }
  0x1c   :  { %p417_p0 = por %p416_p13, %p415_p12 }
  0x1e   :  { %p418_p1 = pnand %p417_p0, %p411_p11 }
  0x20   :  { %421 = shalt.err (!%p418_p1)
}
  0x21   :  { %s452_s0 = smov 640   ;;  %s453_s7 = smov 40  }
  0x22   :  { %32 = dma.hbm_to_vmem [thread:$0]  %s526_s1, 1280, %s479_s15, [#allocation6], %s452_s0, %s452_s0, %s453_s7  }
  0x23   :  { %444 = dma.done.wait [#allocation3], 32  }
  0x24   :  { %445 = vsyncadd [#allocation3], 4294967264 }
  0x25   :  { %446 = dma.done.wait [#allocation6], 1280  }
  0x26   :  { %447 = vsyncadd [#allocation6], 4294966016  ;;  %v454_v0 = vmov 0.0   ;;  %v43_v1 = vld [vmem:[#allocation5 + $0x8] sm:$0xff]  ;;  %v48_v2 = vld [vmem:[#allocation5 + $0x30] sm:$0xff]  ;;  %vm79_vm0 = vcmask 130048   ;;  %v54_v18 = vlaneseq }
  0x27   :  { %147 = vmatprep.mubr.f32.mxu0 %v454_v0  ;;  %218 = vmatprep.mubr.f32.mxu1 %v454_v0  ;;  %v45_v3 = vld [vmem:[#allocation5 + $0x18] sm:$0xff]  ;;  %v358_v4 = vpack.c.bf16 %v48_v2, %v43_v1  ;;  %v50_v5 = vld [vmem:[#allocation5 + $0x40] sm:$0xff]  ;;  %v47_v7 = vld [vmem:[#allocation5 + $0x28] sm:$0xff]  ;;  %v455_v17 = vmov 0.0|0.0   ;;  %vm456_vm1 = vmmov 0  }
  0x28   :  { %v42_v6 = vld [vmem:[#allocation5] sm:$0xff]  ;;  %v362_v8 = vpack.c.bf16 %v50_v5, %v45_v3  ;;  %v44_v10 = vld [vmem:[#allocation5 + $0x10] sm:$0xff]  ;;  %v49_v11 = vld [vmem:[#allocation5 + $0x38] sm:$0xff]  ;;  %v55_v19 = vshrl.u32 %v54_v18, 7  ;;  %v457_v24 = vmov 1983009808  }
  0x29   :  { %v360_v9 = vpack.c.bf16 %v47_v7, %v42_v6  ;;  %359 = vmatprep.subr.bf16.mxu0 %v358_v4  ;;  %v364_v12 = vpack.c.bf16 %v49_v11, %v44_v10  ;;  %v46_v13 = vld [vmem:[#allocation5 + $0x20] sm:$0xff]  ;;  %v51_v14 = vld [vmem:[#allocation5 + $0x48] sm:$0xff]  ;;  %v41_v15 = vld [vmem:[#allocation2] sm:$0x3]  ;;  %v303_v25 = vunpack.c.l.s4 %v457_v24 }
  0x2a   :  { %363 = vmatprep.subr.bf16.mxu1 %v362_v8  ;;  %v367_v16 = vpack.c.bf16 %v51_v14, %v46_v13  ;;  %v56_v20 = vsub.s32 0, %v55_v19  ;;  %v52_v21 = vld [vmem:[%s527_s2] sm:$0x1f]  ;;  %v64_v22 = vsub.s32 2, %v55_v19  ;;  %v60_v23 = vsub.s32 1, %v55_v19  ;;  %s458_s2 = smov [#allocation7]  }
  0x2b   :  { %361 = vmatpush1.bf16.msra.mxu0 %v360_v9  ;;  %365 = vmatpush1.bf16.msra.mxu1 %v364_v12  ;;  %v68_v26 = vsub.s32 3, %v55_v19  ;;  %v72_v28 = vsub.s32 4, %v55_v19  ;;  %v304_v31 = vunpack.c.0.s8 %v303_v25  ;;  %s334_s11 = sshll.u32 %s458_s2, 4  ;;  %s335_s11 = int_to_ptr.vmem [resolvable:$true] %s334_s11 }
  0x2c   :  { %366 = vmatprep.subr.bf16.mxu0 %v455_v17  ;;  %v57_v27 = vrot.slane %v52_v21, %v56_v20  ;;  %v65_v29 = vrot.slane %v52_v21, %v64_v22  ;;  %v61_v30 = vrot.slane %v52_v21, %v60_v23  ;;  %s422_s12 = scalar_lea.vmem %s335_s11, 160  ;;  %p427_p3 = scmp.lt.s32.totalorder %s335_s11, %s335_s11 }
  0x2d   :  { %v69_v32 = vrot.slane %v52_v21, %v68_v26  ;;  %v73_v37 = vrot.slane %v52_v21, %v72_v28  ;;  %v307_v40 = vsub.s32 %v304_v31, %v55_v19  ;;  %p423_p2 = scmp.ne.s32.totalorder %s335_s11, %s422_s12  ;;  %p428_p4 = scmp.lt.s32.totalorder %s422_s12, %s422_s12 }
  0x2e   :  { %344 = vmatmul.mubr.msk.f32.vlgmr.msra.gmra.mrb[0].mxu0 %vm79_vm0, %v41_v15  ;;  %345 = vmatmul.mubr.msk.f32.vlgmr.msra.gmra.mrb[0].mxu1 %vm79_vm0, %v41_v15 }
  0x2f   :  { %368 = vmatpush3.bf16.msra.mxu0 %v367_v16  ;;  %355 = vmatprep.mubr.msk.f32.mxu0 %vm456_vm1, %v454_v0  ;;  %p429_p5 = por %p428_p4, %p427_p3 }
  0x31   :  { %p430_p6 = pnand %p429_p5, %p423_p2 }
  0x32   :  { %356 = vmatmul.mubr.msk.f32.vlgmr.msra.gmra.mrb[2].mxu0 %vm79_vm0, %v41_v15 }
 0x101   :  { %v149_v33 = vpop.f32.mrb[0].mxu0  ;;  %v220_v35 = vpop.f32.mrb[0].mxu1 }
 0x102   :  { %v150_v34 = vadd.f32 %v149_v33, %v57_v27  ;;  %v151_v36 = vpop.f32.mrb[1].mxu0  ;;  %v221_v38 = vadd.f32 %v220_v35, %v65_v29  ;;  %v222_v41 = vpop.f32.mrb[1].mxu1 }
 0x103   :  { %v152_v39 = vadd.f32 %v151_v36, %v61_v30  ;;  %v223_v42 = vadd.f32 %v222_v41, %v69_v32 }
 0x105   :  { %v300_v43 = vcombine.low %v150_v34, %v152_v39  ;;  %v291_v44 = vpop.f32.mrb[2].mxu0  ;;  %v301_v45 = vcombine.low %v221_v38, %v223_v42 }
 0x106   :  { %v292_v46 = vadd.f32 %v291_v44, %v73_v37  ;;  %v357_v47 = vpop.f32.mrb[3].mxu0 }
 0x107   :  { %v308_v48 = vrot.slane %v300_v43, %v307_v40  ;;  %v315_v49 = vrot.slane %v301_v45, %v307_v40 }
 0x108   :  { %347 = vst.sshfl [vmem:[#allocation7 + $0x8] sm:$0x3 pattern:$0x76325410] %v292_v46 }
 0x109   :  { %v316_v50 = vcombine.low %v308_v48, %v315_v49 }
 0x10b   :  { %326 = vst [vmem:[#allocation7] sm:$0xff] %v316_v50 }
 0x10c   :  { %433 = shalt.err (!%p430_p6)
}
 0x10d   :  { %s434_s15 = scalar_lea.hbm %s528_s3, 160 }
 0x10e   :  { %p435_p7 = scmp.ne.s32.totalorder %s528_s3, %s434_s15  ;;  %p438_p8 = scmp.lt.u32.totalorder %s434_s15, %s528_s3 }
 0x110   :  { %p440_p9 = pnand %p438_p8, %p435_p7 }
 0x112   :  { %443 = shalt.err (!%p440_p9)
}
 0x113   :  { %337 = dma.vmem_to_hbm [thread:$0]  %s335_s11, 160, %s528_s3, [#allocation4]  }
 0x114   :  { %448 = dma.done.wait [#allocation4], 160  }
 0x115   :  { %449 = vsyncadd [#allocation4], 4294967136 }
 0x116   :  { %341 = vsyncpa [#allocation3], 1 }
 0x117   :  { %342 = vsyncpa [#allocation6], 1 }
 0x118   :  { %343 = vsyncpa [#allocation4], 1 }

</bundles_post_ra>
